<compile_context>
chip_gen: v7x
topology: tpu7x:2x2x1
jax: 0.10.0
libtpu: 0.0.40
codegen_flags: <defaults>
</compile_context>

<pallas_src>
import jax
import jax.numpy as jnp
from jax.experimental import pallas as pl
from jax.experimental.pallas import tpu as pltpu

_LANE = 128
_SUBLANE = 8


def _round_up(x, m):
    return ((x + m - 1) // m) * m


def linear_probe_kernel(x_ref, w_ref, b_ref, o_ref):
    x = x_ref[...]                                   # (TM, D) f32, VMEM
    w = w_ref[...]                                   # (1, D)  f32, VMEM (resident)
    prod = x * w                                     # VPU broadcast multiply
    row = jnp.sum(prod, axis=1, keepdims=True)       # (TM, 1) XLU lane-reduce
    row_t = jnp.transpose(row, (1, 0))               # (1, TM) lane-dense (XLU slot)
    o_ref[...] = (row_t + b_ref[0]).astype(o_ref.dtype)


def _vmem_capacity_bytes():
    try:
        return int(pltpu.get_tpu_info().vmem_capacity_bytes)
    except Exception:
        return 64 << 20  # conservative: v7x per-TC physical VMEM


def _pick_block_rows(batch, feat, itemsize, vmem_cap):
    # VMEM footprint of one row of x, including lane padding to 128.
    row_bytes = _round_up(feat, _LANE) * itemsize
    # Per-buffer target: ~1/16 of physical VMEM (8 MiB on v5e/v6e, 4 MiB on
    # v7x). Double-buffered x tiles therefore use ~1/8 of VMEM; weight and
    # output blocks are negligible.
    target = min(8 << 20, vmem_cap // 16)

    if batch * row_bytes <= target:
        # Whole (small) batch fits in one tile; round rows to a sublane multiple.
        return _round_up(max(batch, 1), _SUBLANE)

    # Multi-tile: rows must be a multiple of 128 (lane-dense output block).
    tm = max(_LANE, (target // row_bytes) // _LANE * _LANE)
    # Keep at least ~4 tiles so the "parallel" batch axis feeds both v7x
    # TensorCores and the pipeline has DMA/compute overlap.
    tm = min(tm, max(_LANE, _round_up(pl.cdiv(batch, 4), _LANE)))
    return tm


def linear_probe(x, w, b, *, block_rows=None):
    """Forward of LinearProbe: x [B, D] @ w[1, D].T + b[1] -> [B, 1] (f32)."""
    B, D = x.shape
    assert w.shape == (1, D) and b.shape == (1,)

    vmem_cap = _vmem_capacity_bytes()
    if block_rows is None:
        block_rows = _pick_block_rows(B, D, x.dtype.itemsize, vmem_cap)
    num_tiles = pl.cdiv(B, block_rows)
    b_pad = num_tiles * block_rows
    # NOTE: x is NOT padded. The last block may be ragged; Pallas reads
    # unspecified data for out-of-range rows, and those outputs are discarded
    # by the [:B] slice below. Only the tiny (1, b_pad) output is over-sized.

    out_row = pl.pallas_call(
        linear_probe_kernel,
        out_shape=jax.ShapeDtypeStruct((1, b_pad), jnp.float32),
        grid_spec=pl.GridSpec(
            grid=(num_tiles,),
            in_specs=[
                pl.BlockSpec((block_rows, D), lambda i: (i, 0)),   # streamed x tile
                pl.BlockSpec((1, D), lambda i: (0, 0)),            # weights, resident
                pl.BlockSpec(memory_space=pltpu.SMEM),             # bias scalar
            ],
            out_specs=pl.BlockSpec((1, block_rows), lambda i: (0, i)),  # lane-dense slab
        ),
        compiler_params=pltpu.CompilerParams(
            dimension_semantics=("parallel",),   # megacore split of batch axis (v7x)
            vmem_limit_bytes=int(min(vmem_cap // 2, 64 << 20)),
        ),
        cost_estimate=pl.CostEstimate(
            flops=2 * B * D,
            transcendentals=0,
            bytes_accessed=B * D * x.dtype.itemsize + D * 4 + B * 4 + 4,
        ),
    )(x, w, b)

    if b_pad == B:
        return out_row.reshape(B, 1)
    return out_row.reshape(-1)[:B].reshape(B, 1)


if __name__ == "__main__":
    key = jax.random.PRNGKey(0)
    kx, kw, kb = jax.random.split(key, 3)

    batch = 8
    input_size = 32  # probe input ("hidden") size

    x = jax.random.normal(kx, (batch, input_size), dtype=jnp.float32)

    # Deterministic init mimicking nn.Linear's uniform(-1/sqrt(D), 1/sqrt(D));
    # weight kept in PyTorch layout [1, input_size], bias [1].
    bound = 1.0 / jnp.sqrt(jnp.float32(input_size))
    w = jax.random.uniform(kw, (1, input_size), dtype=jnp.float32,
                           minval=-bound, maxval=bound)
    b = jax.random.uniform(kb, (1,), dtype=jnp.float32,
                           minval=-bound, maxval=bound)

    out = jax.block_until_ready(linear_probe(x, w, b))
    ref = x @ w.T + b
    assert out.shape == (batch, 1)
    assert jnp.allclose(out, ref, atol=1e-5, rtol=1e-5)

    # Exercise the multi-tile + ragged-final-block (no-pad) path cheaply.
    batch2 = 300
    x2 = jax.random.normal(kx, (batch2, input_size), dtype=jnp.float32)
    out2 = jax.block_until_ready(linear_probe(x2, w, b, block_rows=128))
    ref2 = x2 @ w.T + b
    assert out2.shape == (batch2, 1)
    assert jnp.allclose(out2, ref2, atol=1e-5, rtol=1e-5)

    print("KERNEL_OK")
</pallas_src>

<mosaic_0001>
module attributes {stable_mosaic.version = 11 : i64} {
  func.func @linear_probe_kernel(%arg0: i32, %arg1: memref<8x32xf32, #tpu.memory_space<vmem>>, %arg2: memref<1x32xf32, #tpu.memory_space<vmem>>, %arg3: memref<1xf32, #tpu.memory_space<smem>>, %arg4: memref<1x8xf32, #tpu.memory_space<vmem>>) attributes {dimension_semantics = [#tpu.dimension_semantics<parallel>], iteration_bounds = array<i64: 1>, scalar_prefetch = 0 : i64, scratch_operands = 0 : i64, tpu.core_type = #tpu.core_type<tc>, window_params = [{transform_indices = @transform_0, window_bounds = array<i64: 8, 32>}, {pipeline_mode = #tpu.pipeline_mode<synchronous>, transform_indices = @transform_1, window_bounds = array<i64: 1, 32>}, {transform_indices = @transform_2, window_bounds = array<i64: 1>}, {transform_indices = @transform_3, window_bounds = array<i64: 1, 8>}]} {
    %c0 = arith.constant 0 : index
    %c0_0 = arith.constant 0 : index
    %0 = vector.load %arg1[%c0, %c0_0] : memref<8x32xf32, #tpu.memory_space<vmem>>, vector<8x32xf32>
    %c0_1 = arith.constant 0 : index
    %c0_2 = arith.constant 0 : index
    %1 = vector.load %arg2[%c0_1, %c0_2] : memref<1x32xf32, #tpu.memory_space<vmem>>, vector<1x32xf32>
    %2 = vector.broadcast %1 : vector<1x32xf32> to vector<8x32xf32>
    %3 = arith.mulf %0, %2 : vector<8x32xf32>
    %cst = arith.constant dense<0.000000e+00> : vector<8xf32>
    %4 = vector.multi_reduction <add>, %3, %cst [1] : vector<8x32xf32> to vector<8xf32>
    %5 = vector.shape_cast %4 : vector<8xf32> to vector<8x1xf32>
    %6 = tpu.transpose %5, [1, 0] : vector<8x1xf32> -> vector<1x8xf32>
    %c0_3 = arith.constant 0 : index
    %7 = memref.load %arg3[%c0_3] : memref<1xf32, #tpu.memory_space<smem>>
    %8 = vector.broadcast %7 : f32 to vector<1x8xf32>
    %9 = arith.addf %6, %8 : vector<1x8xf32>
    %c0_4 = arith.constant 0 : index
    %c0_5 = arith.constant 0 : index
    %10 = vector.load %arg4[%c0_4, %c0_5] : memref<1x8xf32, #tpu.memory_space<vmem>>, vector<1x8xf32>
    tpu.vector_store %arg4[%c0_4, %c0_5], %9 {strides = array<i32>} : memref<1x8xf32, #tpu.memory_space<vmem>>, vector<1x8xf32>,
    return
  }
  func.func @transform_0(%arg0: i32) -> (i32, i32) {
    %c0_i32 = arith.constant 0 : i32
    %c0_i32_0 = arith.constant 0 : i32
    return %arg0, %c0_i32 : i32, i32
  }
  func.func @transform_1(%arg0: i32) -> (i32, i32) {
    %c0_i32 = arith.constant 0 : i32
    %c0_i32_0 = arith.constant 0 : i32
    %c0_i32_1 = arith.constant 0 : i32
    return %c0_i32, %c0_i32_0 : i32, i32
  }
  func.func @transform_2(%arg0: i32) -> i32 {
    %c0_i32 = arith.constant 0 : i32
    %c0_i32_0 = arith.constant 0 : i32
    return %c0_i32 : i32
  }
  func.func @transform_3(%arg0: i32) -> (i32, i32) {
    %c0_i32 = arith.constant 0 : i32
    %c0_i32_0 = arith.constant 0 : i32
    return %c0_i32, %arg0 : i32, i32
  }
}

</mosaic_0001>

<bundles_post_ra>
// kernel: tpu_custom_call.1
= control target key start
LH: loop header
LB: loop body
LE: loop exit
PB: predicated region body
PF: predicated region fallthrough
CT: control target
= control target key end

     0   :  { %9 = vsyncpa [#allocation4], 0  ;;  %s197_s0 = inlined_call_operand.hbm [shape: f32[8,32], index: 0, kind: input, shape index: {}]   ;;  %s198_s1 = inlined_call_operand.vmem [shape: f32[1,32], index: 1, kind: input, shape index: {}]   ;;  %s199_s2 = inlined_call_operand.<no memory space> [shape: f32[1], index: 2, kind: input, shape index: {}]   ;;  %s200_s3 = inlined_call_operand.hbm [shape: f32[1,8], index: 3, kind: output, shape index: {}]  }
   0x1   :  { %10 = vsyncpa [#allocation5], 0  ;;  %s145_s12 = smov [#allocation3]   ;;  %s97_s16 = scalar_lea.hbm %s197_s0, 128 }
   0x2   :  { %s17_s13 = sshll.u32 %s145_s12, 4  ;;  %p98_p0 = scmp.ne.s32.totalorder %s197_s0, %s97_s16  ;;  %s18_s13 = int_to_ptr.vmem [resolvable:$true] %s17_s13 }
   0x3   :  { %p101_p1 = scmp.lt.u32.totalorder %s97_s16, %s197_s0 }
   0x5   :  { %p103_p2 = pnand %p101_p1, %p98_p0 }
   0x7   :  { %106 = shalt.err (!%p103_p2)
}
   0x8   :  { %s107_s21 = scalar_lea.vmem %s18_s13, 128  ;;  %p112_p4 = scmp.lt.s32.totalorder %s18_s13, %s18_s13 }
   0x9   :  { %p108_p3 = scmp.ne.s32.totalorder %s18_s13, %s107_s21  ;;  %p113_p5 = scmp.lt.s32.totalorder %s107_s21, %s107_s21 }
   0xb   :  { %p114_p6 = por %p113_p5, %p112_p4 }
   0xd   :  { %p115_p7 = pnand %p114_p6, %p108_p3 }
   0xf   :  { %118 = shalt.err (!%p115_p7)
}
  0x10   :  { %20 = dma.hbm_to_vmem [thread:$0]  %s197_s0, 128, %s18_s13, [#allocation4]  }
  0x11   :  { %141 = dma.done.wait [#allocation4], 128  }
  0x12   :  { %142 = vsyncadd [#allocation4], 4294967168  ;;  %v28_v0 = vld [vmem:[#allocation3] sm:$0xff]  ;;  %vm37_vm0 = vcmask 261120   ;;  %v74_v5 = vstv %s199_s2  ;;  %s146_s28 = smov [#allocation6]   ;;  %vm76_vm1 = vcmask 57344  }
  0x13   :  { %v93_v1 = vld [vmem:[%s198_s1] ss:$0 sm:$0xff]  ;;  %s84_s29 = sshll.u32 %s146_s28, 4  ;;  %s85_s29 = int_to_ptr.vmem [resolvable:$true] %s84_s29 }
  0x14   :  { %v36_v2 = vmul.f32 %v93_v1, %v28_v0  ;;  %s119_s0 = scalar_lea.vmem %s85_s29, 16  ;;  %s123_s1 = scalar_lea.vmem %s85_s29, 32 }
  0x15   :  { %p120_p8 = scmp.ne.s32.totalorder %s85_s29, %s119_s0  ;;  %p124_p9 = scmp.lt.s32.totalorder %s85_s29, %s85_s29 }
  0x16   :  { %v38_v3 = vsel %vm37_vm0, %v36_v2, 0.0  ;;  %p125_p10 = scmp.lt.s32.totalorder %s123_s1, %s119_s0 }
  0x17   :  { %39 = vadd.xlane.f32.xlu0 %v38_v3 }
  0x18   :  { %p126_p11 = por %p125_p10, %p124_p9 }
  0x1a   :  { %p127_p12 = pnand %p126_p11, %p120_p8 }
  0xa4   :  { %v40_v4 = vpop.xlane.xlu0 %39 }
  0xa5   :  { %41 = vxpose.xlu0.b32.start.end [1/1] (short) (narrow) %v40_v4, 8 }
 0x125   :  { %v57_v6 = vpop.trf.xlu0 }
 0x126   :  { %v75_v7 = vadd.f32 %v74_v5, %v57_v6 }
 0x128   :  { %77 = vst.msk [vmem:[#allocation6] sm:$0x1] %vm76_vm1, %v75_v7 }
 0x129   :  { %130 = shalt.err (!%p127_p12)
}
 0x12a   :  { %s131_s5 = scalar_lea.hbm %s200_s3, 16 }
 0x12b   :  { %p132_p13 = scmp.ne.s32.totalorder %s200_s3, %s131_s5  ;;  %p135_p0 = scmp.lt.u32.totalorder %s131_s5, %s200_s3 }
 0x12d   :  { %p137_p1 = pnand %p135_p0, %p132_p13 }
 0x12f   :  { %140 = shalt.err (!%p137_p1)
}
 0x130   :  { %87 = dma.vmem_to_hbm [thread:$0]  %s85_s29, 16, %s200_s3, [#allocation5]  }
 0x131   :  { %143 = dma.done.wait [#allocation5], 16  }
 0x132   :  { %144 = vsyncadd [#allocation5], 4294967280 }
 0x133   :  { %91 = vsyncpa [#allocation4], 1 }
 0x134   :  { %92 = vsyncpa [#allocation5], 1 }

</bundles_post_ra>
